<compile_context>
chip_gen: v6e
topology: v6e:2x2x1
jax: 0.10.0
libtpu: 0.0.40
codegen_flags: <defaults>
</compile_context>

<pallas_src>
import jax
import jax.numpy as jnp
from jax.experimental import pallas as pl
from jax.experimental.pallas import tpu as pltpu

_NEG_BIG = -1e30  # "minus infinity" for padded class columns (avoids inf/NaN)


def _round_up(x, m):
    return ((x + m - 1) // m) * m


def pack_params(params, n_input):
    """Pack 4x (w [in,out], b [1,out]) into one weight slab and one bias slab.

    Returns:
      w_packed: [n_in_p + 3*P, P] f32  (layer i occupies a contiguous row band)
      b_packed: [4, P] f32             (row i = bias of layer i, lane-padded)
      meta:     (n_in_p, P, n_output)
    """
    ws = [params[k][0] for k in ("f1", "f2", "f3", "f4")]
    bs = [params[k][1] for k in ("f1", "f2", "f3", "f4")]
    n_output = ws[3].shape[1]
    n_in_p = _round_up(n_input, 8)
    P = _round_up(max(w.shape[1] for w in ws), 128)

    w_blocks, b_rows = [], []
    for li, (w, b) in enumerate(zip(ws, bs)):
        in_dim = n_in_p if li == 0 else P
        wp = jnp.zeros((in_dim, P), jnp.float32)
        wp = wp.at[: w.shape[0], : w.shape[1]].set(w.astype(jnp.float32))
        # Hidden layers: padded bias = 0 (ReLU keeps padded lanes at 0).
        # Final layer: padded bias = -1e30 so padded logits drop out of
        # the log_softmax reduction.
        fill = 0.0 if li < 3 else _NEG_BIG
        bp = jnp.full((P,), fill, jnp.float32)
        bp = bp.at[: b.shape[1]].set(b[0].astype(jnp.float32))
        w_blocks.append(wp)
        b_rows.append(bp)

    w_packed = jnp.concatenate(w_blocks, axis=0)
    b_packed = jnp.stack(b_rows, axis=0)
    return w_packed, b_packed, (n_in_p, P, n_output)


def _make_kernel(n_in_p, P):
    # Static (sublane-aligned) row offsets of each layer inside the weight slab.
    o1 = 0
    o2 = o1 + n_in_p
    o3 = o2 + P
    o4 = o3 + P
    o5 = o4 + P

    def kernel(x_ref, w_ref, b_ref, o_ref):
        h = x_ref[...]  # (TB, n_in_p)

        h = jnp.maximum(
            jnp.dot(h, w_ref[o1:o2, :], preferred_element_type=jnp.float32)
            + b_ref[0:1, :], 0.0)
        h = jnp.maximum(
            jnp.dot(h, w_ref[o2:o3, :], preferred_element_type=jnp.float32)
            + b_ref[1:2, :], 0.0)
        h = jnp.maximum(
            jnp.dot(h, w_ref[o3:o4, :], preferred_element_type=jnp.float32)
            + b_ref[2:3, :], 0.0)
        logits = (
            jnp.dot(h, w_ref[o4:o5, :], preferred_element_type=jnp.float32)
            + b_ref[3:4, :])  # (TB, P); padded lanes ~= -1e30

        # Numerically stable log_softmax over the class axis.
        m = jnp.max(logits, axis=-1, keepdims=True)
        shifted = logits - m
        lse = jnp.log(jnp.sum(jnp.exp(shifted), axis=-1, keepdims=True))
        o_ref[...] = shifted - lse  # lane-dense (TB, P) store

    return kernel


def pendigits_net_forward(x, w_packed, b_packed, meta, *, block_b=512):
    """x: [B, n_input] float32. Returns log_softmax logits [B, n_output]."""
    n_in_p, P, n_output = meta
    B, n_in = x.shape
    x = x.astype(jnp.float32)
    if n_in < n_in_p:
        x = jnp.pad(x, ((0, 0), (0, n_in_p - n_in)))

    tb = min(block_b, _round_up(B, 8))  # batch tile, multiple of 8
    grid = (pl.cdiv(B, tb),)

    out = pl.pallas_call(
        _make_kernel(n_in_p, P),
        out_shape=jax.ShapeDtypeStruct((B, P), jnp.float32),
        grid=grid,
        in_specs=[
            pl.BlockSpec((tb, n_in_p), lambda i: (i, 0)),       # streamed x
            pl.BlockSpec(w_packed.shape, lambda i: (0, 0)),     # resident W
            pl.BlockSpec(b_packed.shape, lambda i: (0, 0)),     # resident b
        ],
        out_specs=pl.BlockSpec((tb, P), lambda i: (i, 0)),
        compiler_params=pltpu.CompilerParams(
            dimension_semantics=("parallel",)),
    )(x, w_packed, b_packed)

    return out[:, :n_output]


def init_params(key, n_input, n_hidden1, n_hidden2, n_hidden3, n_output):
    """Deterministic init mimicking nn.Linear default (U(-1/sqrt(fan_in), +))."""
    dims = [(n_input, n_hidden1), (n_hidden1, n_hidden2),
            (n_hidden2, n_hidden3), (n_hidden3, n_output)]
    names = ["f1", "f2", "f3", "f4"]
    params = {}
    for name, (fan_in, fan_out) in zip(names, dims):
        key, kw, kb = jax.random.split(key, 3)
        bound = 1.0 / (fan_in ** 0.5)
        w = jax.random.uniform(kw, (fan_in, fan_out), jnp.float32, -bound, bound)
        b = jax.random.uniform(kb, (1, fan_out), jnp.float32, -bound, bound)
        params[name] = (w, b)
    return params


def _reference_forward(x, params):
    h = x
    for name in ["f1", "f2", "f3"]:
        w, b = params[name]
        h = jnp.maximum(h @ w + b, 0.0)
    w, b = params["f4"]
    logits = h @ w + b
    return jax.nn.log_softmax(logits, axis=1)


if __name__ == "__main__":
    # Pendigits-style sizes, kept small: 16 input features, 10 classes.
    batch = 8
    n_input, n_hidden1, n_hidden2, n_hidden3, n_output = 16, 32, 32, 32, 10

    key = jax.random.PRNGKey(0)
    key, kx = jax.random.split(key)
    x = jax.random.normal(kx, (batch, n_input), dtype=jnp.float32)

    params = init_params(key, n_input, n_hidden1, n_hidden2, n_hidden3, n_output)
    w_packed, b_packed, meta = pack_params(params, n_input)

    out = pendigits_net_forward(x, w_packed, b_packed, meta)
    out = jax.block_until_ready(out)

    ref = _reference_forward(x, params)
    assert out.shape == (batch, n_output)
    assert jnp.allclose(out, ref, atol=1e-5, rtol=1e-5), (
        float(jnp.max(jnp.abs(out - ref))))

    print("KERNEL_OK")
</pallas_src>

<mosaic_0001>
module attributes {stable_mosaic.version = 11 : i64} {
  func.func @kernel(%arg0: i32, %arg1: memref<8x16xf32, #tpu.memory_space<vmem>>, %arg2: memref<400x128xf32, #tpu.memory_space<vmem>>, %arg3: memref<4x128xf32, #tpu.memory_space<vmem>>, %arg4: memref<8x128xf32, #tpu.memory_space<vmem>>) attributes {dimension_semantics = [#tpu.dimension_semantics<parallel>], iteration_bounds = array<i64: 1>, scalar_prefetch = 0 : i64, scratch_operands = 0 : i64, tpu.core_type = #tpu.core_type<tc>, window_params = [{transform_indices = @transform_0, window_bounds = array<i64: 8, 16>}, {pipeline_mode = #tpu.pipeline_mode<synchronous>, transform_indices = @transform_1, window_bounds = array<i64: 400, 128>}, {pipeline_mode = #tpu.pipeline_mode<synchronous>, transform_indices = @transform_2, window_bounds = array<i64: 4, 128>}, {transform_indices = @transform_3, window_bounds = array<i64: 8, 128>}]} {
    %c0 = arith.constant 0 : index
    %c0_0 = arith.constant 0 : index
    %0 = vector.load %arg1[%c0, %c0_0] : memref<8x16xf32, #tpu.memory_space<vmem>>, vector<8x16xf32>
    %c0_1 = arith.constant 0 : index
    %c0_2 = arith.constant 0 : index
    %1 = vector.load %arg2[%c0_1, %c0_2] : memref<400x128xf32, #tpu.memory_space<vmem>>, vector<16x128xf32>
    %cst = arith.constant dense<0.000000e+00> : vector<8x128xf32>
    %2 = tpu.matmul %0, %1, %cst {dimension_numbers = #tpu.dot_dimension_numbers<[1], [0], [0], [1], [0, 0, 1, 1], [], []>} : vector<8x16xf32>, vector<16x128xf32>, vector<8x128xf32> -> vector<8x128xf32>
    %c0_3 = arith.constant 0 : index
    %c0_4 = arith.constant 0 : index
    %3 = vector.load %arg3[%c0_3, %c0_4] : memref<4x128xf32, #tpu.memory_space<vmem>>, vector<1x128xf32>
    %4 = vector.broadcast %3 : vector<1x128xf32> to vector<8x128xf32>
    %5 = arith.addf %2, %4 : vector<8x128xf32>
    %cst_5 = arith.constant 0.000000e+00 : f32
    %6 = vector.broadcast %cst_5 : f32 to vector<8x128xf32>
    %7 = arith.maximumf %5, %6 : vector<8x128xf32>
    %c16 = arith.constant 16 : index
    %c0_6 = arith.constant 0 : index
    %8 = vector.load %arg2[%c16, %c0_6] : memref<400x128xf32, #tpu.memory_space<vmem>>, vector<128x128xf32>
    %cst_7 = arith.constant dense<0.000000e+00> : vector<8x128xf32>
    %9 = tpu.matmul %7, %8, %cst_7 {dimension_numbers = #tpu.dot_dimension_numbers<[1], [0], [0], [1], [0, 0, 1, 1], [], []>} : vector<8x128xf32>, vector<128x128xf32>, vector<8x128xf32> -> vector<8x128xf32>
    %c1 = arith.constant 1 : index
    %c0_8 = arith.constant 0 : index
    %10 = vector.load %arg3[%c1, %c0_8] : memref<4x128xf32, #tpu.memory_space<vmem>>, vector<1x128xf32>
    %11 = vector.broadcast %10 : vector<1x128xf32> to vector<8x128xf32>
    %12 = arith.addf %9, %11 : vector<8x128xf32>
    %cst_9 = arith.constant 0.000000e+00 : f32
    %13 = vector.broadcast %cst_9 : f32 to vector<8x128xf32>
    %14 = arith.maximumf %12, %13 : vector<8x128xf32>
    %c144 = arith.constant 144 : index
    %c0_10 = arith.constant 0 : index
    %15 = vector.load %arg2[%c144, %c0_10] : memref<400x128xf32, #tpu.memory_space<vmem>>, vector<128x128xf32>
    %cst_11 = arith.constant dense<0.000000e+00> : vector<8x128xf32>
    %16 = tpu.matmul %14, %15, %cst_11 {dimension_numbers = #tpu.dot_dimension_numbers<[1], [0], [0], [1], [0, 0, 1, 1], [], []>} : vector<8x128xf32>, vector<128x128xf32>, vector<8x128xf32> -> vector<8x128xf32>
    %c2 = arith.constant 2 : index
    %c0_12 = arith.constant 0 : index
    %17 = vector.load %arg3[%c2, %c0_12] : memref<4x128xf32, #tpu.memory_space<vmem>>, vector<1x128xf32>
    %18 = vector.broadcast %17 : vector<1x128xf32> to vector<8x128xf32>
    %19 = arith.addf %16, %18 : vector<8x128xf32>
    %cst_13 = arith.constant 0.000000e+00 : f32
    %20 = vector.broadcast %cst_13 : f32 to vector<8x128xf32>
    %21 = arith.maximumf %19, %20 : vector<8x128xf32>
    %c272 = arith.constant 272 : index
    %c0_14 = arith.constant 0 : index
    %22 = vector.load %arg2[%c272, %c0_14] : memref<400x128xf32, #tpu.memory_space<vmem>>, vector<128x128xf32>
    %cst_15 = arith.constant dense<0.000000e+00> : vector<8x128xf32>
    %23 = tpu.matmul %21, %22, %cst_15 {dimension_numbers = #tpu.dot_dimension_numbers<[1], [0], [0], [1], [0, 0, 1, 1], [], []>} : vector<8x128xf32>, vector<128x128xf32>, vector<8x128xf32> -> vector<8x128xf32>
    %c3 = arith.constant 3 : index
    %c0_16 = arith.constant 0 : index
    %24 = vector.load %arg3[%c3, %c0_16] : memref<4x128xf32, #tpu.memory_space<vmem>>, vector<1x128xf32>
    %25 = vector.broadcast %24 : vector<1x128xf32> to vector<8x128xf32>
    %26 = arith.addf %23, %25 : vector<8x128xf32>
    %cst_17 = arith.constant dense<0xFF800000> : vector<8xf32>
    %27 = vector.multi_reduction <maximumf>, %26, %cst_17 [1] : vector<8x128xf32> to vector<8xf32>
    %28 = vector.shape_cast %27 : vector<8xf32> to vector<8x1xf32>
    %29 = vector.broadcast %28 : vector<8x1xf32> to vector<8x128xf32>
    %30 = arith.subf %26, %29 : vector<8x128xf32>
    %31 = math.exp %30 : vector<8x128xf32>
    %cst_18 = arith.constant dense<0.000000e+00> : vector<8xf32>
    %32 = vector.multi_reduction <add>, %31, %cst_18 [1] : vector<8x128xf32> to vector<8xf32>
    %33 = vector.shape_cast %32 : vector<8xf32> to vector<8x1xf32>
    %34 = math.log %33 : vector<8x1xf32>
    %35 = vector.broadcast %34 : vector<8x1xf32> to vector<8x128xf32>
    %36 = arith.subf %30, %35 : vector<8x128xf32>
    %c0_19 = arith.constant 0 : index
    %c0_20 = arith.constant 0 : index
    %37 = vector.load %arg4[%c0_19, %c0_20] : memref<8x128xf32, #tpu.memory_space<vmem>>, vector<8x128xf32>
    tpu.vector_store %arg4[%c0_19, %c0_20], %36 {strides = array<i32>} : memref<8x128xf32, #tpu.memory_space<vmem>>, vector<8x128xf32>,
    return
  }
  func.func @transform_0(%arg0: i32) -> (i32, i32) {
    %c0_i32 = arith.constant 0 : i32
    %c0_i32_0 = arith.constant 0 : i32
    return %arg0, %c0_i32 : i32, i32
  }
  func.func @transform_1(%arg0: i32) -> (i32, i32) {
    %c0_i32 = arith.constant 0 : i32
    %c0_i32_0 = arith.constant 0 : i32
    %c0_i32_1 = arith.constant 0 : i32
    return %c0_i32, %c0_i32_0 : i32, i32
  }
  func.func @transform_2(%arg0: i32) -> (i32, i32) {
    %c0_i32 = arith.constant 0 : i32
    %c0_i32_0 = arith.constant 0 : i32
    %c0_i32_1 = arith.constant 0 : i32
    return %c0_i32, %c0_i32_0 : i32, i32
  }
  func.func @transform_3(%arg0: i32) -> (i32, i32) {
    %c0_i32 = arith.constant 0 : i32
    %c0_i32_0 = arith.constant 0 : i32
    return %arg0, %c0_i32 : i32, i32
  }
}

</mosaic_0001>

<bundles_post_ra>
// kernel: tpu_custom_call.1
= control target key start
LH: loop header
LB: loop body
LE: loop exit
PB: predicated region body
PF: predicated region fallthrough
CT: control target
= control target key end

     0   :  { %8 = vsyncpa [#allocation3], 0  ;;  %s804_s0 = inlined_call_operand.hbm [shape: f32[8,16], index: 0, kind: input, shape index: {}]   ;;  %s805_s1 = inlined_call_operand.hbm [shape: f32[400,128], index: 1, kind: input, shape index: {}]   ;;  %s806_s2 = inlined_call_operand.hbm [shape: f32[4,128], index: 2, kind: input, shape index: {}]   ;;  %s807_s3 = inlined_call_operand.hbm [shape: f32[8,128], index: 3, kind: output, shape index: {}]  }
   0x1   :  { %9 = vsyncpa [#allocation6], 0 }
   0x2   :  { %10 = vsyncpa [#allocation4], 0  ;;  %s706_s12 = smov [#allocation5]  }
   0x3   :  { %s26_s13 = sshll.u32 %s706_s12, 4  ;;  %s27_s13 = int_to_ptr.vmem [resolvable:$true] %s26_s13 }
   0x4   :  { %s628_s14 = scalar_lea.vmem %s27_s13, 6400  ;;  %p633_p1 = scmp.lt.s32.totalorder %s27_s13, %s27_s13 }
   0x5   :  { %p629_p0 = scmp.ne.s32.totalorder %s27_s13, %s628_s14  ;;  %p634_p2 = scmp.lt.s32.totalorder %s628_s14, %s628_s14 }
   0x7   :  { %p635_p3 = por %p634_p2, %p633_p1 }
   0x9   :  { %p636_p4 = pnand %p635_p3, %p629_p0 }
   0xb   :  { %639 = shalt.err (!%p636_p4)
}
   0xc   :  { %s707_s15 = smov 128   ;;  %s708_s16 = smov 8  }
   0xd   :  { %32 = dma.hbm_to_vmem [thread:$0]  %s805_s1, 6400, %s27_s13, [#allocation6], %s707_s15, %s707_s15, %s708_s16  }
   0xe   :  { %s709_s19 = smov [#allocation2]   ;;  %s710_s21 = smov [#allocation7]  }
   0xf   :  { %s17_s20 = sshll.u32 %s709_s19, 4  ;;  %s39_s22 = sshll.u32 %s710_s21, 4  ;;  %s18_s20 = int_to_ptr.vmem [resolvable:$true] %s17_s20  ;;  %s40_s22 = int_to_ptr.vmem [resolvable:$true] %s39_s22 }
  0x10   :  { %s648_s23 = scalar_lea.vmem %s18_s20, 128  ;;  %p653_p6 = scmp.lt.s32.totalorder %s18_s20, %s18_s20 }
  0x11   :  { %p649_p5 = scmp.ne.s32.totalorder %s18_s20, %s648_s23  ;;  %p654_p7 = scmp.lt.s32.totalorder %s648_s23, %s648_s23 }
  0x13   :  { %p655_p8 = por %p654_p7, %p653_p6 }
  0x15   :  { %p656_p9 = pnand %p655_p8, %p649_p5 }
  0x17   :  { %659 = shalt.err (!%p656_p9)
}
  0x18   :  { %20 = dma.hbm_to_vmem [thread:$0]  %s804_s0, 128, %s18_s20, [#allocation3]  }
  0x19   :  { %s668_s26 = scalar_lea.vmem %s40_s22, 64  ;;  %p673_p11 = scmp.lt.s32.totalorder %s40_s22, %s40_s22 }
  0x1a   :  { %p669_p10 = scmp.ne.s32.totalorder %s40_s22, %s668_s26  ;;  %p674_p12 = scmp.lt.s32.totalorder %s668_s26, %s668_s26 }
  0x1c   :  { %p675_p13 = por %p674_p12, %p673_p11 }
  0x1e   :  { %p676_p0 = pnand %p675_p13, %p669_p10 }
  0x20   :  { %679 = shalt.err (!%p676_p0)
}
  0x21   :  { %42 = dma.hbm_to_vmem [thread:$0]  %s806_s2, 64, %s40_s22, [#allocation6]  }
  0x22   :  { %700 = dma.done.wait [#allocation3], 128  }
  0x23   :  { %701 = vsyncadd [#allocation3], 4294967168 }
  0x24   :  { %702 = dma.done.wait [#allocation6], 6464  }
  0x25   :  { %703 = vsyncadd [#allocation6], 4294960832  ;;  %v711_v0 = vmov 0.0   ;;  %vm712_vm0 = vmmov 0   ;;  %v54_v1 = vld [vmem:[#allocation5 + $0x8] sm:$0xff]  ;;  %v53_v2 = vld [vmem:[#allocation5] sm:$0xff] }
  0x26   :  { %496 = vmatprep.subr.mxu0 %v711_v0  ;;  %500 = vmatprep.mubr.msk.f32.mxu0 %vm712_vm0, %v711_v0  ;;  %v52_v3 = vld [vmem:[#allocation2] sm:$0xff]  ;;  %vm60_vm1 = vcmask 130048   ;;  %v150_v4 = vld [vmem:[#allocation5 + $0x88] sm:$0xff]  ;;  %v149_v5 = vld [vmem:[#allocation5 + $0x80] sm:$0xff]  ;;  %s713_s0 = smov [#allocation8]  }
  0x27   :  { %503 = vmatprep.subr.mxu1 %v711_v0  ;;  %535 = vmatprep.mubr.msk.f32.mxu1 %vm712_vm0, %v711_v0  ;;  %v148_v6 = vld [vmem:[#allocation5 + $0x78] sm:$0xff]  ;;  %v147_v7 = vld [vmem:[#allocation5 + $0x70] sm:$0xff]  ;;  %v146_v8 = vld [vmem:[#allocation5 + $0x68] sm:$0xff]  ;;  %s427_s2 = sshll.u32 %s713_s0, 4  ;;  %s428_s2 = int_to_ptr.vmem [resolvable:$true] %s427_s2 }
  0x28   :  { %497 = vmatpush3.msra.mxu0 %v54_v1  ;;  %504 = vmatpush3.msra.mxu1 %v150_v4  ;;  %v145_v9 = vld [vmem:[#allocation5 + $0x60] sm:$0xff]  ;;  %v144_v10 = vld [vmem:[#allocation5 + $0x58] sm:$0xff]  ;;  %v143_v11 = vld [vmem:[#allocation5 + $0x50] sm:$0xff]  ;;  %s680_s28 = scalar_lea.vmem %s428_s2, 128  ;;  %p685_p2 = scmp.lt.s32.totalorder %s428_s2, %s428_s2 }
  0x29   :  { %498 = vmatprep.subr.mxu0 %v711_v0  ;;  %505 = vmatprep.subr.mxu1 %v711_v0  ;;  %v142_v12 = vld [vmem:[#allocation5 + $0x48] sm:$0xff]  ;;  %v141_v13 = vld [vmem:[#allocation5 + $0x40] sm:$0xff]  ;;  %v140_v14 = vld [vmem:[#allocation5 + $0x38] sm:$0xff]  ;;  %p681_p1 = scmp.ne.s32.totalorder %s428_s2, %s680_s28  ;;  %p686_p3 = scmp.lt.s32.totalorder %s680_s28, %s680_s28 }
  0x2a   :  { %499 = vmatpush3.msra.mxu0 %v53_v2  ;;  %506 = vmatpush3.msra.mxu1 %v149_v5  ;;  %v139_v15 = vld [vmem:[#allocation5 + $0x30] sm:$0xff]  ;;  %v138_v16 = vld [vmem:[#allocation5 + $0x28] sm:$0xff]  ;;  %v137_v17 = vld [vmem:[#allocation5 + $0x20] sm:$0xff] }
  0x2b   :  { %501 = vmatmul.mubr.msk.f32.vlgmr.msra.gmra.mxu0 %vm60_vm1, %v52_v3  ;;  %507 = vmatprep.subr.mxu1 %v711_v0  ;;  %v136_v18 = vld [vmem:[#allocation5 + $0x18] sm:$0xff]  ;;  %v135_v19 = vld [vmem:[#allocation5 + $0x10] sm:$0xff]  ;;  %v242_v20 = vld [vmem:[#allocation5 + $0x108] sm:$0xff]  ;;  %p687_p4 = por %p686_p3, %p685_p2 }
  0x2c   :  { %538 = vmatprep.subr.mxu0 %v711_v0  ;;  %508 = vmatpush3.msra.mxu1 %v148_v6  ;;  %v241_v21 = vld [vmem:[#allocation5 + $0x100] sm:$0xff]  ;;  %v240_v22 = vld [vmem:[#allocation5 + $0xf8] sm:$0xff]  ;;  %v239_v23 = vld [vmem:[#allocation5 + $0xf0] sm:$0xff] }
  0x2d   :  { %570 = vmatprep.mubr.msk.f32.mxu0 %vm712_vm0, %v711_v0  ;;  %509 = vmatprep.subr.mxu1 %v711_v0  ;;  %v238_v24 = vld [vmem:[#allocation5 + $0xe8] sm:$0xff]  ;;  %v237_v25 = vld [vmem:[#allocation5 + $0xe0] sm:$0xff]  ;;  %v236_v26 = vld [vmem:[#allocation5 + $0xd8] sm:$0xff]  ;;  %p688_p5 = pnand %p687_p4, %p681_p1 }
  0x2e   :  { %510 = vmatpush3.msra.mxu1 %v147_v7  ;;  %539 = vmatpush3.msra.mxu0 %v242_v20  ;;  %v235_v27 = vld [vmem:[#allocation5 + $0xd0] sm:$0xff]  ;;  %v234_v28 = vld [vmem:[#allocation5 + $0xc8] sm:$0xff]  ;;  %v233_v29 = vld [vmem:[#allocation5 + $0xc0] sm:$0xff] }
  0x2f   :  { %511 = vmatprep.subr.mxu1 %v711_v0  ;;  %540 = vmatprep.subr.mxu0 %v711_v0  ;;  %v232_v30 = vld [vmem:[#allocation5 + $0xb8] sm:$0xff]  ;;  %v231_v31 = vld [vmem:[#allocation5 + $0xb0] sm:$0xff]  ;;  %v230_v32 = vld [vmem:[#allocation5 + $0xa8] sm:$0xff] }
  0x30   :  { %512 = vmatpush3.msra.mxu1 %v146_v8  ;;  %541 = vmatpush3.msra.mxu0 %v241_v21  ;;  %v437_v33 = vld [vmem:[#allocation7] ss:$0 sm:$0xff]  ;;  %v229_v38 = vld [vmem:[#allocation5 + $0xa0] sm:$0xff]  ;;  %v228_v39 = vld [vmem:[#allocation5 + $0x98] sm:$0xff] }
  0x31   :  { %513 = vmatprep.subr.mxu1 %v711_v0  ;;  %542 = vmatprep.subr.mxu0 %v711_v0  ;;  %v227_v40 = vld [vmem:[#allocation5 + $0x90] sm:$0xff]  ;;  %v334_v41 = vld [vmem:[#allocation5 + $0x188] sm:$0xff]  ;;  %v333_v42 = vld [vmem:[#allocation5 + $0x180] sm:$0xff] }
  0x32   :  { %514 = vmatpush3.msra.mxu1 %v145_v9  ;;  %543 = vmatpush3.msra.mxu0 %v240_v22  ;;  %v332_v43 = vld [vmem:[#allocation5 + $0x178] sm:$0xff]  ;;  %v331_v44 = vld [vmem:[#allocation5 + $0x170] sm:$0xff]  ;;  %v330_v45 = vld [vmem:[#allocation5 + $0x168] sm:$0xff] }
  0x33   :  { %515 = vmatprep.subr.mxu1 %v711_v0  ;;  %544 = vmatprep.subr.mxu0 %v711_v0  ;;  %v329_v46 = vld [vmem:[#allocation5 + $0x160] sm:$0xff]  ;;  %v328_v47 = vld [vmem:[#allocation5 + $0x158] sm:$0xff]  ;;  %v327_v48 = vld [vmem:[#allocation5 + $0x150] sm:$0xff] }
  0x34   :  { %516 = vmatpush3.msra.mxu1 %v144_v10  ;;  %545 = vmatpush3.msra.mxu0 %v239_v23  ;;  %v326_v49 = vld [vmem:[#allocation5 + $0x148] sm:$0xff]  ;;  %v325_v50 = vld [vmem:[#allocation5 + $0x140] sm:$0xff]  ;;  %v324_v51 = vld [vmem:[#allocation5 + $0x138] sm:$0xff] }
  0x35   :  { %517 = vmatprep.subr.mxu1 %v711_v0  ;;  %546 = vmatprep.subr.mxu0 %v711_v0  ;;  %v323_v52 = vld [vmem:[#allocation5 + $0x130] sm:$0xff]  ;;  %v322_v53 = vld [vmem:[#allocation5 + $0x128] sm:$0xff]  ;;  %v321_v59 = vld [vmem:[#allocation5 + $0x120] sm:$0xff] }
  0x36   :  { %518 = vmatpush3.msra.mxu1 %v143_v11  ;;  %547 = vmatpush3.msra.mxu0 %v238_v24  ;;  %v439_v54 = vld [vmem:[#allocation7 + $0x1] ss:$0 sm:$0xff]  ;;  %v320_v60 = vld [vmem:[#allocation5 + $0x118] sm:$0xff]  ;;  %v440_v62 = vld [vmem:[#allocation7 + $0x2] ss:$0 sm:$0xff] }
  0x37   :  { %519 = vmatprep.subr.mxu1 %v711_v0  ;;  %548 = vmatprep.subr.mxu0 %v711_v0  ;;  %v319_v61 = vld [vmem:[#allocation5 + $0x110] sm:$0xff] }
  0x38   :  { %520 = vmatpush3.msra.mxu1 %v142_v12  ;;  %549 = vmatpush3.msra.mxu0 %v237_v25  ;;  %v441_v4 = vld [vmem:[#allocation7 + $0x3] ss:$0 sm:$0xff] }
  0x39   :  { %521 = vmatprep.subr.mxu1 %v711_v0  ;;  %550 = vmatprep.subr.mxu0 %v711_v0 }
  0x3a   :  { %522 = vmatpush3.msra.mxu1 %v141_v13  ;;  %551 = vmatpush3.msra.mxu0 %v236_v26 }
  0x3b   :  { %523 = vmatprep.subr.mxu1 %v711_v0  ;;  %552 = vmatprep.subr.mxu0 %v711_v0 }
  0x3c   :  { %524 = vmatpush3.msra.mxu1 %v140_v14  ;;  %553 = vmatpush3.msra.mxu0 %v235_v27 }
  0x3d   :  { %525 = vmatprep.subr.mxu1 %v711_v0  ;;  %554 = vmatprep.subr.mxu0 %v711_v0 }
  0x3e   :  { %526 = vmatpush3.msra.mxu1 %v139_v15  ;;  %555 = vmatpush3.msra.mxu0 %v234_v28 }
  0x3f   :  { %527 = vmatprep.subr.mxu1 %v711_v0  ;;  %556 = vmatprep.subr.mxu0 %v711_v0 }
  0x40   :  { %528 = vmatpush3.msra.mxu1 %v138_v16  ;;  %557 = vmatpush3.msra.mxu0 %v233_v29 }
  0x41   :  { %529 = vmatprep.subr.mxu1 %v711_v0  ;;  %558 = vmatprep.subr.mxu0 %v711_v0 }
  0x42   :  { %530 = vmatpush3.msra.mxu1 %v137_v17  ;;  %559 = vmatpush3.msra.mxu0 %v232_v30 }
  0x43   :  { %531 = vmatprep.subr.mxu1 %v711_v0  ;;  %560 = vmatprep.subr.mxu0 %v711_v0 }
  0x44   :  { %532 = vmatpush3.msra.mxu1 %v136_v18  ;;  %561 = vmatpush3.msra.mxu0 %v231_v31 }
  0x45   :  { %533 = vmatprep.subr.mxu1 %v711_v0  ;;  %562 = vmatprep.subr.mxu0 %v711_v0 }
  0x46   :  { %534 = vmatpush3.msra.mxu1 %v135_v19  ;;  %563 = vmatpush3.msra.mxu0 %v230_v32 }
  0x47   :  { %573 = vmatprep.subr.mxu1 %v711_v0  ;;  %564 = vmatprep.subr.mxu0 %v711_v0 }
  0x48   :  { %565 = vmatpush3.msra.mxu0 %v229_v38 }
  0x49   :  { %566 = vmatprep.subr.mxu0 %v711_v0 }
  0x4a   :  { %567 = vmatpush3.msra.mxu0 %v228_v39 }
  0x4b   :  { %568 = vmatprep.subr.mxu0 %v711_v0 }
  0x4c   :  { %569 = vmatpush3.msra.mxu0 %v227_v40 }
  0xeb   :  { %v130_v34 = vpop.f32.mrf.mxu0 }
  0xec   :  { %v131_v35 = vadd.f32 %v437_v33, %v130_v34 }
  0xed   :  { %v502_v36 = vpop.f32.mrf.mxu0 }
  0xee   :  { %v134_v37 = vmax.f32 %v131_v35, 0.0 }
  0xf0   :  { %536 = vmatmul.mubr.f32.vlgmr.msra.gmra.mxu1 %v134_v37 }
  0xf1   :  { %605 = vmatprep.mubr.msk.f32.mxu1 %vm712_vm0, %v711_v0  ;;  %574 = vmatpush3.msra.mxu1 %v334_v41 }
  0xf2   :  { %575 = vmatprep.subr.mxu1 %v711_v0 }
  0xf3   :  { %576 = vmatpush3.msra.mxu1 %v333_v42 }
  0xf4   :  { %577 = vmatprep.subr.mxu1 %v711_v0 }
  0xf5   :  { %578 = vmatpush3.msra.mxu1 %v332_v43 }
  0xf6   :  { %579 = vmatprep.subr.mxu1 %v711_v0 }
  0xf7   :  { %580 = vmatpush3.msra.mxu1 %v331_v44 }
  0xf8   :  { %581 = vmatprep.subr.mxu1 %v711_v0 }
  0xf9   :  { %582 = vmatpush3.msra.mxu1 %v330_v45 }
  0xfa   :  { %583 = vmatprep.subr.mxu1 %v711_v0 }
  0xfb   :  { %584 = vmatpush3.msra.mxu1 %v329_v46 }
  0xfc   :  { %585 = vmatprep.subr.mxu1 %v711_v0 }
  0xfd   :  { %586 = vmatpush3.msra.mxu1 %v328_v47 }
  0xfe   :  { %587 = vmatprep.subr.mxu1 %v711_v0 }
  0xff   :  { %588 = vmatpush3.msra.mxu1 %v327_v48 }
 0x100   :  { %589 = vmatprep.subr.mxu1 %v711_v0 }
 0x101   :  { %590 = vmatpush3.msra.mxu1 %v326_v49 }
 0x102   :  { %591 = vmatprep.subr.mxu1 %v711_v0 }
 0x103   :  { %592 = vmatpush3.msra.mxu1 %v325_v50 }
 0x104   :  { %593 = vmatprep.subr.mxu1 %v711_v0 }
 0x105   :  { %594 = vmatpush3.msra.mxu1 %v324_v51 }
 0x106   :  { %595 = vmatprep.subr.mxu1 %v711_v0 }
 0x107   :  { %596 = vmatpush3.msra.mxu1 %v323_v52 }
 0x108   :  { %597 = vmatprep.subr.mxu1 %v711_v0 }
 0x109   :  { %598 = vmatpush3.msra.mxu1 %v322_v53 }
 0x10a   :  { %599 = vmatprep.subr.mxu1 %v711_v0 }
 0x10b   :  { %600 = vmatpush3.msra.mxu1 %v321_v59 }
 0x10c   :  { %601 = vmatprep.subr.mxu1 %v711_v0 }
 0x10d   :  { %602 = vmatpush3.msra.mxu1 %v320_v60 }
 0x10e   :  { %603 = vmatprep.subr.mxu1 %v711_v0 }
 0x10f   :  { %604 = vmatpush3.msra.mxu1 %v319_v61 }
 0x1b0   :  { %v222_v55 = vpop.f32.mrf.mxu1 }
 0x1b1   :  { %v223_v56 = vadd.f32 %v439_v54, %v222_v55 }
 0x1b2   :  { %v537_v57 = vpop.f32.mrf.mxu1 }
 0x1b3   :  { %v226_v58 = vmax.f32 %v223_v56, 0.0 }
 0x1b5   :  { %571 = vmatmul.mubr.f32.vlgmr.msra.gmra.mxu0 %v226_v58 }
 0x275   :  { %v314_v63 = vpop.f32.mrf.mxu0 }
 0x276   :  { %v315_v1 = vadd.f32 %v440_v62, %v314_v63 }
 0x277   :  { %v572_v2 = vpop.f32.mrf.mxu0 }
 0x278   :  { %v318_v3 = vmax.f32 %v315_v1, 0.0 }
 0x27a   :  { %606 = vmatmul.mubr.f32.vlgmr.msra.gmra.mxu1 %v318_v3 }
 0x33a   :  { %v406_v5 = vpop.f32.mrf.mxu1 }
 0x33b   :  { %v407_v6 = vadd.f32 %v441_v4, %v406_v5 }
 0x33c   :  { %v607_v7 = vpop.f32.mrf.mxu1 }
 0x33d   :  { %410 = vmax.xlane.f32.xlu0 %v407_v6 }
 0x3c6   :  { %v411_v8 = vpop.xlane.xlu0 %410 }
 0x3c7   :  { %v412_v9 = vsub.f32 %v407_v6, %v411_v8 }
 0x3c9   :  { %v413_v10 = vmul.f32 1.442695, %v412_v9 }
 0x3cb   :  { %616 = vpow2.f32 %v413_v10 }
 0x3d8   :  { %v617_v11 = vpop.eup %616 }
 0x3d9   :  { %415 = vadd.xlane.f32.xlu0 %v617_v11 }
 0x462   :  { %v416_v0 = vpop.xlane.xlu0 %415 }
 0x463   :  { %618 = vlog2.f32 %v416_v0 }
 0x470   :  { %v619_v12 = vpop.eup %618 }
 0x471   :  { %v418_v13 = vmul.f32 0.6931472, %v619_v12 }
 0x473   :  { %v419_v14 = vsub.f32 %v412_v9, %v418_v13 }
 0x475   :  { %420 = vst [vmem:[#allocation8] sm:$0xff] %v419_v14 }
 0x476   :  { %691 = shalt.err (!%p688_p5)
}
 0x477   :  { %430 = dma.vmem_to_hbm [thread:$0]  %s428_s2, 128, %s807_s3, [#allocation4]  }
 0x478   :  { %704 = dma.done.wait [#allocation4], 128  }
 0x479   :  { %705 = vsyncadd [#allocation4], 4294967168 }
 0x47a   :  { %434 = vsyncpa [#allocation3], 1 }
 0x47b   :  { %435 = vsyncpa [#allocation6], 1 }
 0x47c   :  { %436 = vsyncpa [#allocation4], 1 }

</bundles_post_ra>
